<compile_context>
chip_gen: v7x
topology: tpu7x:2x2x1
jax: 0.10.0
libtpu: 0.0.40
codegen_flags: <defaults>
</compile_context>

<pallas_src>
import jax
import jax.numpy as jnp
from jax.experimental import pallas as pl
from jax.experimental.pallas import tpu as pltpu


def _round_down(a, b):
    return a // b * b


def _check_static(drop_prob, training):
    # drop_prob / training select code paths at trace time: they must be
    # static Python values, not traced arrays.
    if isinstance(drop_prob, jax.Array) or isinstance(training, jax.Array):
        raise TypeError(
            "drop_prob and training must be static Python values "
            "(they are used in Python-level control flow).")


def _choose_blocks(n, feat, dtype):
    """Pick (bn, bf) tile sizes for the (N, feat) streamed view.

    Goals:
      * ~2 MiB per streamed tensor per grid step (amortize per-step overhead,
        safe under v7x's 64 MiB VMEM even with 3 double-buffered streams).
      * bf a multiple of 128 (unmasked vst except at the ragged edge block).
      * blocks never exceed the logical extents -> no wrapper-side padding.
      * enough grid blocks to shard across both v7x TensorCores.
    """
    itemsize = jnp.dtype(dtype).itemsize
    sub = {4: 8, 2: 16, 1: 32}.get(itemsize, 8)
    target_bytes = 2 * 1024 * 1024

    # Sublane block: multiple of `sub`, never exceeding n (full extent if small).
    if n <= sub:
        bn = n
    else:
        bn = min(_round_down(n, sub), 512)

    # Lane block: multiple of 128, never exceeding feat (full extent if small).
    if feat <= 128:
        bf = feat
    else:
        want = max(128, _round_down(target_bytes // (bn * itemsize), 128))
        bf = min(_round_down(feat, 128), want)
        # Keep enough grid blocks to feed both v7x TensorCores.
        gi = pl.cdiv(n, bn)
        if gi * pl.cdiv(feat, bf) < 4 and feat >= 4 * 128:
            bf = min(bf, max(128, _round_down(feat // 4, 128)))
    return bn, bf


def _sample_scale(key, n, keep_prob, dtype):
    # timm drop_path mask: floor(keep_prob + U[0,1)) per sample, in {0, 1}.
    # Scale is kept in the activation dtype (matches timm's divide-in-dtype).
    u = jax.random.uniform(key, (n,), dtype=jnp.float32)
    mask = jnp.floor(keep_prob + u)
    return (mask / keep_prob).astype(dtype).reshape(n, 1)


def _drop_path_kernel(scale_ref, x_ref, o_ref):
    # scale_ref: (BN, 1) per-sample scale (0 or 1/keep_prob), same dtype as x.
    # x_ref / o_ref: (BN, BF) lane-dense tiles (ragged edges masked by Pallas).
    o_ref[...] = x_ref[...] * scale_ref[...]


def _drop_path_add_kernel(scale_ref, x_ref, r_ref, o_ref):
    # Fused DropPath + residual add: out = shortcut + x * scale.
    o_ref[...] = r_ref[...] + x_ref[...] * scale_ref[...]


def _launch(kernel, scale, tensors, dtype, n, feat, bn, bf):
    grid = (pl.cdiv(n, bn), pl.cdiv(feat, bf))
    tile_spec = pl.BlockSpec((bn, bf), lambda i, j: (i, j))
    scale_spec = pl.BlockSpec((bn, 1), lambda i, j: (i, 0))
    return pl.pallas_call(
        kernel,
        out_shape=jax.ShapeDtypeStruct((n, feat), dtype),
        grid=grid,
        in_specs=[scale_spec] + [tile_spec] * len(tensors),
        out_specs=tile_spec,
        compiler_params=pltpu.CompilerParams(
            dimension_semantics=("parallel", "parallel"),
            vmem_limit_bytes=48 * 1024 * 1024,
        ),
    )(scale, *tensors)


def drop_path(x, drop_prob, training, key):
    """Pallas implementation of DropPath.forward (NCHW or any N-leading layout)."""
    _check_static(drop_prob, training)
    if drop_prob == 0.0 or not training:
        return x
    assert 0.0 <= drop_prob < 1.0, "drop_prob must be in [0, 1)"
    keep_prob = 1.0 - drop_prob
    n = x.shape[0]
    x2 = x.reshape(n, -1)
    feat = x2.shape[1]

    bn, bf = _choose_blocks(n, feat, x2.dtype)
    scale = _sample_scale(key, n, keep_prob, x2.dtype)
    out = _launch(_drop_path_kernel, scale, [x2], x2.dtype, n, feat, bn, bf)
    return out.reshape(x.shape)


def drop_path_add(x, shortcut, drop_prob, training, key):
    """Fused `shortcut + drop_path(x)` — the MBConv shortcut-branch epilogue."""
    _check_static(drop_prob, training)
    if drop_prob == 0.0 or not training:
        return shortcut + x
    assert 0.0 <= drop_prob < 1.0, "drop_prob must be in [0, 1)"
    assert x.shape == shortcut.shape
    keep_prob = 1.0 - drop_prob
    n = x.shape[0]
    x2 = x.reshape(n, -1)
    r2 = shortcut.reshape(n, -1)
    feat = x2.shape[1]

    bn, bf = _choose_blocks(n, feat, x2.dtype)
    scale = _sample_scale(key, n, keep_prob, x2.dtype)
    out = _launch(_drop_path_add_kernel, scale, [x2, r2], x2.dtype,
                  n, feat, bn, bf)
    return out.reshape(x.shape)


# TODO(synk): the Conv2d/BatchNorm/SiLU/SE/AdaptiveAvgPool/Linear stages of
# EfficientNetV1 are left to XLA; only DropPath (and its residual-add fusion)
# is implemented as a standalone Pallas kernel here.


if __name__ == "__main__":
    key = jax.random.PRNGKey(0)
    kx, ks, km = jax.random.split(key, 3)

    N, C, H, W = 2, 4, 16, 16
    x = jax.random.normal(kx, (N, C, H, W), dtype=jnp.float32)
    shortcut = jax.random.normal(ks, (N, C, H, W), dtype=jnp.float32)
    drop_prob = 0.25
    keep_prob = 1.0 - drop_prob

    # Pure-JAX reference with identical randomness.
    u = jax.random.uniform(km, (N,), dtype=jnp.float32)
    scale_ref = (jnp.floor(keep_prob + u) / keep_prob)[:, None, None, None]

    # 1) Standalone DropPath kernel (training=True so the path is exercised).
    y = drop_path(x, drop_prob, training=True, key=km)
    jax.block_until_ready(y)
    y_ref = x * scale_ref
    assert jnp.allclose(y, y_ref, atol=1e-6, rtol=1e-6)

    # 2) Fused DropPath + residual add.
    y2 = drop_path_add(x, shortcut, drop_prob, training=True, key=km)
    jax.block_until_ready(y2)
    y2_ref = shortcut + x * scale_ref
    assert jnp.allclose(y2, y2_ref, atol=1e-6, rtol=1e-6)

    # 3) Eval mode / drop_prob == 0 return the input unchanged.
    assert jnp.array_equal(drop_path(x, drop_prob, training=False, key=km), x)
    assert jnp.array_equal(drop_path(x, 0.0, training=True, key=km), x)

    # 4) Ragged shapes, handled in-kernel (no wrapper pad/slice): N not a
    #    multiple of 8 and features not a multiple of 128 — like the 320x7x7
    #    EfficientNet head. Grid here is (2, 2) with masked edge blocks.
    N2, C2, H2, W2 = 10, 5, 7, 7
    xr = jax.random.normal(kx, (N2, C2, H2, W2), dtype=jnp.float32)
    rr = jax.random.normal(ks, (N2, C2, H2, W2), dtype=jnp.float32)
    ur = jax.random.uniform(km, (N2,), dtype=jnp.float32)
    scale_r = (jnp.floor(keep_prob + ur) / keep_prob)[:, None, None, None]
    yr = drop_path(xr, drop_prob, training=True, key=km)
    yr2 = drop_path_add(xr, rr, drop_prob, training=True, key=km)
    jax.block_until_ready((yr, yr2))
    assert jnp.allclose(yr, xr * scale_r, atol=1e-6, rtol=1e-6)
    assert jnp.allclose(yr2, rr + xr * scale_r, atol=1e-6, rtol=1e-6)

    print("KERNEL_OK")
</pallas_src>

<mosaic_0001>
module attributes {stable_mosaic.version = 11 : i64} {
  func.func @_drop_path_kernel(%arg0: i32, %arg1: i32, %arg2: memref<2x1xf32, #tpu.memory_space<vmem>>, %arg3: memref<2x256xf32, #tpu.memory_space<vmem>>, %arg4: memref<2x256xf32, #tpu.memory_space<vmem>>) attributes {dimension_semantics = [#tpu.dimension_semantics<parallel>, #tpu.dimension_semantics<parallel>], iteration_bounds = array<i64: 1, 4>, scalar_prefetch = 0 : i64, scratch_operands = 0 : i64, tpu.core_type = #tpu.core_type<tc>, window_params = [{transform_indices = @transform_0, window_bounds = array<i64: 2, 1>}, {transform_indices = @transform_1, window_bounds = array<i64: 2, 256>}, {transform_indices = @transform_2, window_bounds = array<i64: 2, 256>}]} {
    %c0 = arith.constant 0 : index
    %c0_0 = arith.constant 0 : index
    %0 = vector.load %arg3[%c0, %c0_0] : memref<2x256xf32, #tpu.memory_space<vmem>>, vector<2x256xf32>
    %c0_1 = arith.constant 0 : index
    %c0_2 = arith.constant 0 : index
    %1 = vector.load %arg2[%c0_1, %c0_2] : memref<2x1xf32, #tpu.memory_space<vmem>>, vector<2x1xf32>
    %2 = vector.broadcast %1 : vector<2x1xf32> to vector<2x256xf32>
    %3 = arith.mulf %0, %2 : vector<2x256xf32>
    %c0_3 = arith.constant 0 : index
    %c0_4 = arith.constant 0 : index
    %4 = vector.load %arg4[%c0_3, %c0_4] : memref<2x256xf32, #tpu.memory_space<vmem>>, vector<2x256xf32>
    tpu.vector_store %arg4[%c0_3, %c0_4], %3 {strides = array<i32>} : memref<2x256xf32, #tpu.memory_space<vmem>>, vector<2x256xf32>,
    return
  }
  func.func @transform_0(%arg0: i32, %arg1: i32) -> (i32, i32) {
    %c0_i32 = arith.constant 0 : i32
    %c0_i32_0 = arith.constant 0 : i32
    return %arg0, %c0_i32 : i32, i32
  }
  func.func @transform_1(%arg0: i32, %arg1: i32) -> (i32, i32) {
    %c0_i32 = arith.constant 0 : i32
    return %arg0, %arg1 : i32, i32
  }
  func.func @transform_2(%arg0: i32, %arg1: i32) -> (i32, i32) {
    %c0_i32 = arith.constant 0 : i32
    return %arg0, %arg1 : i32, i32
  }
}

</mosaic_0001>

<bundles_post_ra>
// kernel: tpu_custom_call.1
= control target key start
LH: loop header
LB: loop body
LE: loop exit
PB: predicated region body
PF: predicated region fallthrough
CT: control target
= control target key end

     0   :  { %7 = vsyncpa [#allocation3], 0  ;;  %s718_s0 = inlined_call_operand.vmem [shape: f32[2,1], index: 0, kind: input, shape index: {}]   ;;  %s719_s1 = inlined_call_operand.hbm [shape: f32[2,1024], index: 1, kind: input, shape index: {}]   ;;  %s720_s2 = inlined_call_operand.hbm [shape: f32[2,1024], index: 2, kind: output, shape index: {}]  }
   0x1   :  { %9 = vsyncpa [#allocation3 + $0x1], 0 }
   0x2   :  { %10 = vsyncpa [#allocation4], 0 }
   0x3   :  { %12 = vsyncpa [#allocation4 + $0x1], 0  ;;  %s545_s9 = smov 0   ;;  %s547_s10 = smov 0  }
   0x4   :  { %s549_s11 = smov 0   ;;  %s551_s12 = smov 0  }
   0x5   :  { %s553_s13 = smov 0   ;;  %s555_s14 = smov 0  }
   0x6 LB: > { %s329_s15 = sadd.s32 4294967295, %s524_s14   ;;  %s330_s16 = sadd.s32 4294967294, %s524_s14   ;;  %s524_s14 = sphi %s555_s14, %s18_s14   ;;  %s520_s13 = sphi %s553_s13, %s735_s13   ;;  %s516_s12 = sphi %s551_s12, %s734_s12   ;;  %s512_s11 = sphi %s549_s11, %s733_s11   ;;  %s508_s10 = sphi %s547_s10, %s732_s10   ;;  %s504_s9 = sphi %s545_s9, %s731_s9  }
   0x7   : > { %s27_s17 = sadd.s32 1, %s520_s13  ;;  %s65_s18 = sadd.s32 1, %s512_s11 }
   0x8   : > { %p28_p0 = scmp.ge.s32.totalorder %s27_s17, 4  ;;  %p72_p1 = scmp.ne.s32.totalorder %s512_s11, %s508_s10 }
   0x9   : > { %p73_p2 = scmp.eq.s32.totalorder %s524_s14, 0  ;;  %p78_p3 = scmp.ne.s32.totalorder %s508_s10, %s504_s9 }
   0xa   : > { %s737_s17 = smov (%p28_p0, %s27_s17), 0  ;;  %p79_p5 = scmp.eq.s32.totalorder %s329_s15, 0 }
   0xb   : > { %p586_p4 = por %p73_p2, %p72_p1  ;;  %s61_s20 = ssub.s32 %s520_s13, %s737_s17 }
   0xc   : > { %p104_p6 = scmp.eq.s32.totalorder %s329_s15, 3  ;;  %p63_p7 = scmp.eq.s32.totalorder %s61_s20, 0 }
   0xd   : > { %p592_p8 = por %p79_p5, %p78_p3  ;;  %p110_p10 = scmp.eq.s32.totalorder %s330_s16, 3 }
   0xe   : > { %p596_p9 = por %p104_p6, %p72_p1  ;;  %p359_p12 = scmp.lt.s32.totalorder %s524_s14, 4 }
   0xf   : > { %s601_s23 = scalar_select %p63_p7, %s512_s11, %s65_s18  }
  0x10   : > { %s724_s22 = scalar_select %p596_p9, 1, 0 }
  0x11   : > { %p603_p11 = por %p110_p10, %p78_p3  ;;  %s137_s25 = sand.u32 1, %s512_s11  }
  0x12   : > { %s334_s26 = sshll.u32 %s137_s25, 2  ;;  %s345_s27 = sshll.u32 %s520_s13, 6 }
  0x13   : > { %s725_s24 = scalar_select %p603_p11, 1, 0 }
  0x14   : > { %s613_s30 = scalar_lea.hbm %s719_s1, %s345_s27  ;;  %s141_s3 = scalar_lea.vmem [#allocation2], %s334_s26 }
  0x15   : > { %s151_s4 = sshll.u32 %s141_s3, 4  ;;  %p619_p13 = pnand %p359_p12, %p586_p4  ;;  %s615_s4 = int_to_ptr.vmem [resolvable:$true] %s151_s4 }
  0x16   : > { %s138_s6 = scalar_lea.sflag [#allocation3], %s137_s25  ;;  %s412_s7 = scalar_lea.hbm %s613_s30, 64 }
  0x17   : > { %p413_p2 = scmp.ne.s32.totalorder %s613_s30, %s412_s7  ;;  %p414_p3 = pneg %p619_p13 }
  0x18   : > { %s417_s16 = scalar_lea.hbm %s719_s1, 256  ;;  %p418_p4 = scmp.lt.u32.totalorder %s613_s30, %s719_s1 }
  0x19   : > { %p415_p5 = pnand %p414_p3, %p413_p2  ;;  %p419_p7 = scmp.lt.u32.totalorder %s417_s16, %s412_s7 }
  0x1a   : > { %p421_p12 = scmp.lt.u32.totalorder %s412_s7, %s613_s30 }
  0x1b   : > { %p416_p6 = pneg %p415_p5  ;;  %p420_p10 = por %p419_p7, %p418_p4 }
  0x1d   : > { %p422_p0 = por %p421_p12, %p420_p10 }
  0x1f   : > { %p423_p1 = pnand %p422_p0, %p416_p6 }
  0x21   : > { %426 = shalt.err (!%p423_p1)
}
  0x22   : > { %s427_s20 = scalar_lea.vmem %s615_s4, 64  ;;  %s526_s25 = smov [#allocation2]  }
  0x23   : > { %p428_p2 = scmp.ne.s32.totalorder %s615_s4, %s427_s20  ;;  %s432_s26 = sshll.u32 %s526_s25, 4  ;;  %s433_s26 = int_to_ptr.vmem [resolvable:$false] %s432_s26 }
  0x24   : > { %s434_s27 = scalar_lea.vmem %s433_s26, 128  ;;  %p435_p9 = scmp.lt.s32.totalorder %s615_s4, %s433_s26 }
  0x25   : > { %p430_p5 = pnand %p428_p2, %p414_p3  ;;  %p436_p4 = scmp.lt.s32.totalorder %s434_s27, %s427_s20 }
  0x27   : > { %p431_p11 = pneg %p430_p5  ;;  %p437_p7 = por %p436_p4, %p435_p9 }
  0x29   : > { %p438_p10 = pnand %p437_p7, %p431_p11 }
  0x2b   : > { %441 = shalt.err (!%p438_p10)
}
  0x2c   : > { %354 = dma.hbm_to_vmem [thread:$0]  (!%p619_p13), %s613_s30, 64, %s615_s4, %s138_s6  }
  0x2d   : > { %p727_p0 = scmp.lt.s32.totalorder %s524_s14, 5  ;;  %p728_p1 = scmp.ge.s32.totalorder %s524_s14, 1 }
  0x2f   : > { %p157_p3 = pnand %p728_p1, %p727_p0 }
  0x30   : > { %s655_s28 = sand.u32 (!%p157_p3), 1, %s508_s10  }
  0x31   : > { %160 = sbr.rel (%p157_p3) target bundleno = 205 (0xcd), region = 28  ;;  %s338_s29 = sshll.u32 (!%p157_p3), %s655_s28, 2 }
  0x32   : > { %s163_s3 = scalar_lea.sflag (!%p157_p3), [#allocation3], %s655_s28  ;;  %s166_s7 = scalar_lea.vmem (!%p157_p3), [#allocation2], %s338_s29 }
  0x38   : > { %495 = dma.done.wait (%p592_p8), %s163_s3, 64  }
  0x39   : > { %497 = vsyncadd (%p592_p8), %s163_s3, 4294967232  ;;  %v527_v0 = vmov 0   ;;  %v198_v1 = vld [vmem:[%s718_s0] sm:$0x3]  ;;  %v528_v2 = vmov 269488144   ;;  %v206_v4 = vlaneseq }
  0x3a   : > { %411 = vset.pattern.permute.xlu0 %v527_v0  ;;  %v204_v3 = vunpack.c.l.s4 %v528_v2  ;;  %v197_v9 = vld [vmem:[%s166_s7] sm:$0xf]  ;;  %s346_s21 = sshll.u32 %s516_s12, 6  ;;  %s190_s5 = scalar_lea.vmem [#allocation5], %s338_s29 }
  0x3b   : > { %201 = vperm.xlu0 %411, %v198_v1   ;;  %v207_v6 = vshrl.u32 %v206_v4, 7  ;;  %s230_s6 = sshll.u32 %s190_s5, 4  ;;  %s670_s16 = scalar_lea.hbm %s720_s2, %s346_s21  ;;  %s672_s6 = int_to_ptr.vmem [resolvable:$true] %s230_s6 }
  0x3c   : > { %v205_v5 = vunpack.c.0.s8 %v204_v3  ;;  %s214_s18 = scalar_lea.sflag [#allocation4], %s655_s28  ;;  %s442_s19 = scalar_lea.vmem %s672_s6, 64 }
  0x3d   : > { %p443_p8 = scmp.ne.s32.totalorder %s672_s6, %s442_s19  ;;  %p729_p9 = scmp.ne.s32.totalorder %s724_s22, 0 }
  0x3e   : > { %v208_v7 = vsub.s32 %v205_v5, %v207_v6  ;;  %s529_s12 = smov [#allocation5]  }
  0x3f   : > { %p444_p11 = pnand %p443_p8, %p729_p9  ;;  %s446_s20 = sshll.u32 %s529_s12, 4  ;;  %s447_s20 = int_to_ptr.vmem [resolvable:$false] %s446_s20 }
  0x40   : > { %s448_s25 = scalar_lea.vmem %s447_s20, 128  ;;  %p449_p6 = scmp.lt.s32.totalorder %s672_s6, %s447_s20 }
  0x41   : > { %p445_p13 = pneg %p444_p11  ;;  %p450_p12 = scmp.lt.s32.totalorder %s448_s25, %s442_s19 }
  0x43   : > { %p451_p2 = por %p450_p12, %p449_p6 }
  0x45   : > { %p452_p5 = pnand %p451_p2, %p445_p13 }
  0xba   : > { %v202_v8 = vpop.permute.xlu0 %201 }
  0xbb   : > { %v209_v10 = vrot.slane %v202_v8, %v208_v7 }
  0xbd   : > { %v211_v11 = vmul.f32 %v209_v10, %v197_v9 }
  0xbf   : > { %212 = vst [vmem:[%s190_s5] sm:$0xf] %v211_v11 }
  0xc0   : > { %455 = shalt.err (!%p452_p5)
}
  0xc1   : > { %s456_s26 = scalar_lea.hbm %s670_s16, 64  ;;  %s460_s29 = scalar_lea.hbm %s720_s2, 256 }
  0xc2   : > { %p457_p4 = scmp.ne.s32.totalorder %s670_s16, %s456_s26  ;;  %p461_p0 = scmp.lt.u32.totalorder %s670_s16, %s720_s2 }
  0xc3   : > { %p462_p1 = scmp.lt.u32.totalorder %s460_s29, %s456_s26  ;;  %p464_p8 = scmp.lt.u32.totalorder %s456_s26, %s670_s16 }
  0xc4   : > { %p458_p7 = pnand %p457_p4, %p729_p9 }
  0xc5   : > { %p463_p3 = por %p462_p1, %p461_p0 }
  0xc6   : > { %p459_p10 = pneg %p458_p7 }
  0xc7   : > { %p465_p11 = por %p464_p8, %p463_p3 }
  0xc9   : > { %p466_p13 = pnand %p465_p11, %p459_p10 }
  0xcb   : > { %469 = shalt.err (!%p466_p13)
}
  0xcc   : > { %349 = dma.vmem_to_hbm [thread:$0]  (%p729_p9), %s672_s6, 64, %s670_s16, %s214_s18  }
  0xcd PF: > { %p360_p6 = scmp.ge.s32.totalorder %s524_s14, 2  ;;  %s242_s30 = sand.u32 1, %s504_s9  }
  0xce   : > { %p730_p12 = scmp.ne.s32.totalorder %s725_s24, 0  ;;  %s243_s4 = scalar_lea.sflag [#allocation4], %s242_s30 }
  0xd0   : > { %p356_p2 = pnand %p360_p6, %p730_p12 }
  0xd2   : > { %499 = dma.done.wait (!%p356_p2), %s243_s4, 64  }
  0xd3   : > { %501 = vsyncadd (!%p356_p2), %s243_s4, 4294967232  ;;  %s18_s14 = sadd.s32 1, %s524_s14   ;;  %s731_s9 = smov %s508_s10 }
  0xd4   : > { %p15_p5 = scmp.ge.s32.totalorder %s18_s14, 6   ;;  %s732_s10 = smov %s512_s11 }
  0xd5   : > { %s733_s11 = smov %s601_s23  ;;  %s734_s12 = smov %s520_s13 }
  0xd6   : > { %s735_s13 = smov %s737_s17  ;;  %17 = sbr.rel (!%p15_p5) target bundleno = 6 (0x6), region = 76 }
  0xdd   :  { %248 = vsyncpa [#allocation3], 1 }
  0xde   :  { %250 = vsyncpa [#allocation3 + $0x1], 1 }
  0xdf   :  { %251 = vsyncpa [#allocation4], 1 }
  0xe0   :  { %253 = vsyncpa [#allocation4 + $0x1], 1 }

</bundles_post_ra>
